<compile_context>
chip_gen: v7x
topology: tpu7x:2x2x1
jax: 0.10.0
libtpu: 0.0.40
codegen_flags: <defaults>
</compile_context>

<pallas_src>
import functools

import jax
import jax.numpy as jnp
from jax import lax
from jax.experimental import pallas as pl
from jax.experimental.pallas import tpu as pltpu


# ---------------------------------------------------------------------------
# Configuration (synthetic, small shapes)
# ---------------------------------------------------------------------------
EMBEDDING_DIM = 32
NUM_LAYERS = 2
HIDDEN_DIM = 32
Z_PRIME = 1
N_SG = 231             # space groups 0..230 (indexed by sg number directly)
SG_FEAT_DIM = 237
SG_ROWS_PAD = 256      # one-hot / table rows padded to a power of two

MISC_DIM = 12 + 4                      # prior (12) + four step scalars
V_FLAT_DIM = EMBEDDING_DIM * 3         # 96
INPUT_DIM = EMBEDDING_DIM + MISC_DIM + V_FLAT_DIM + SG_FEAT_DIM   # 381
OUTPUT_DIM = 6 + Z_PRIME * 6 + 2       # 14

H_PAD = 128            # hidden width padded to one full vreg lane width
OUT_PAD = 128          # lane-dense output slab; real columns are [:OUTPUT_DIM]
COMPUTE_DTYPE = jnp.bfloat16   # MXU operand dtype (f32 accumulation)


def _round_up(x, m):
    return (x + m - 1) // m * m


# ---------------------------------------------------------------------------
# Pallas kernel: scalarMLP forward on one batch tile
# ---------------------------------------------------------------------------
def _mlp_kernel(x_ref, misc_ref, v_ref, sgi_ref,
                sg_tab_ref, w_x_ref, w_misc_ref, w_v_ref, b_in_ref,
                w_hid_ref, b_hid_ref, w_out_ref, b_out_ref,
                o_ref, *, num_layers):
    tm = x_ref.shape[0]

    # Space-group contribution via exact-integer one-hot + MXU matmul against
    # the VMEM-resident [256,128] table (out-of-range / padded rows -> zero).
    one_hot = (sgi_ref[...] ==
               lax.broadcasted_iota(jnp.int32, (tm, SG_ROWS_PAD), 1)
               ).astype(COMPUTE_DTYPE)

    # Input projection: per-segment matmuls against row-slices of W_in,
    # summed in f32 together with the bias.
    h = (jnp.dot(x_ref[...].astype(COMPUTE_DTYPE), w_x_ref[...],
                 preferred_element_type=jnp.float32)
         + jnp.dot(misc_ref[...].astype(COMPUTE_DTYPE), w_misc_ref[...],
                   preferred_element_type=jnp.float32)
         + jnp.dot(v_ref[...].astype(COMPUTE_DTYPE), w_v_ref[...],
                   preferred_element_type=jnp.float32)
         + jnp.dot(one_hot, sg_tab_ref[...],
                   preferred_element_type=jnp.float32)
         + b_in_ref[...])

    # Residual hidden layers (norm=None, dropout=0 -> identity).
    # TODO(synk): PyTorch nn.GELU defaults to the exact erf form; tanh
    # approximation is used here for a guaranteed TPU lowering.
    for l in range(num_layers):
        z = (jnp.dot(h.astype(COMPUTE_DTYPE), w_hid_ref[l],
                     preferred_element_type=jnp.float32)
             + b_hid_ref[l])
        h = h + jax.nn.gelu(z, approximate=True)

    # Output projection into a lane-dense 128-wide bf16 slab (cols >=
    # OUTPUT_DIM are zero because the padded weight columns / biases are zero).
    o_ref[...] = (jnp.dot(h.astype(COMPUTE_DTYPE), w_out_ref[...],
                          preferred_element_type=jnp.float32)
                  + b_out_ref[...]).astype(o_ref.dtype)


def scalar_mlp_pallas(x, misc, v_flat, sg_idx, params, *, tile_m=1024):
    """Run the scalarMLP over a batch of rows, tiled along the batch axis."""
    n = x.shape[0]
    # Largest tile <= tile_m that still gives >= 2 grid steps (so the
    # "parallel" axis can shard across v7x's two TensorCores), rounded to 16
    # rows for bf16 sublane packing.  No host padding: Pallas masks the
    # partial final block.
    tm = max(16, min(tile_m, _round_up((n + 1) // 2, 16)))
    grid = (pl.cdiv(n, tm),)

    def batch_spec(cols):
        return pl.BlockSpec((tm, cols), lambda i: (i, 0))

    def const2(shape):            # weights stay VMEM-resident across steps
        return pl.BlockSpec(shape, lambda i: (0, 0))

    def const3(shape):
        return pl.BlockSpec(shape, lambda i: (0, 0, 0))

    kernel = functools.partial(_mlp_kernel, num_layers=NUM_LAYERS)
    out = pl.pallas_call(
        kernel,
        out_shape=jax.ShapeDtypeStruct((n, OUT_PAD), jnp.bfloat16),
        grid=grid,
        in_specs=[
            batch_spec(EMBEDDING_DIM),            # x        (f32)
            batch_spec(MISC_DIM),                 # misc     (f32)
            batch_spec(V_FLAT_DIM),               # v_flat   (f32)
            batch_spec(1),                        # sg index (int32)
            const2((SG_ROWS_PAD, H_PAD)),         # sg table (bf16)
            const2((EMBEDDING_DIM, H_PAD)),       # w_x      (bf16)
            const2((MISC_DIM, H_PAD)),            # w_misc   (bf16)
            const2((V_FLAT_DIM, H_PAD)),          # w_v      (bf16)
            const2((1, H_PAD)),                   # b_in     (f32)
            const3((NUM_LAYERS, H_PAD, H_PAD)),   # w_hid    (bf16)
            const3((NUM_LAYERS, 1, H_PAD)),       # b_hid    (f32)
            const2((H_PAD, OUT_PAD)),             # w_out    (bf16)
            const2((1, OUT_PAD)),                 # b_out    (f32)
        ],
        out_specs=batch_spec(OUT_PAD),
        compiler_params=pltpu.CompilerParams(
            # batch tiles are independent -> shard across v7x's 2 TensorCores
            dimension_semantics=("parallel",)),
    )(x, misc, v_flat, sg_idx,
      params["sg_table"], params["w_x"], params["w_misc"], params["w_v"],
      params["b_in"], params["w_hid"], params["b_hid"],
      params["w_out"], params["b_out"])
    return out


# ---------------------------------------------------------------------------
# CrystalGenerator forward (thin glue in JAX, MLP in Pallas)
# ---------------------------------------------------------------------------
def crystal_generator_forward(params, x, v, sg_ind_list, prior,
                              max_length_step, max_angle_step,
                              max_position_step, max_orientation_step):
    n = x.shape[0]
    v_flat = v.reshape(n, v.shape[1] * v.shape[2])             # [N, 96] (view)

    # Tiny residual host-side concat (16 cols, 64 B/row) so the in-kernel
    # matmul K dims stay multiples of 16; everything else streams directly.
    misc = jnp.concatenate(
        [prior, max_length_step, max_angle_step,
         max_position_step, max_orientation_step], axis=1)     # [N, 16]

    sg_idx = sg_ind_list.astype(jnp.int32).reshape(n, 1)        # [N, 1]

    out_slab = scalar_mlp_pallas(x, misc, v_flat, sg_idx, params)  # [N,128] bf16
    outputs = out_slab[:, :OUTPUT_DIM].astype(jnp.float32)         # [N, 14]
    return outputs[:, :12], outputs[:, 12], outputs[:, 13]


# ---------------------------------------------------------------------------
# Deterministic parameter init (synthetic weights, not a checkpoint)
# ---------------------------------------------------------------------------
def init_params(key, sg_feature_tensor):
    ks = jax.random.split(key, 8)
    scale_in = 1.0 / jnp.sqrt(INPUT_DIM)
    scale_h = 1.0 / jnp.sqrt(HIDDEN_DIM)

    # "True" (unpadded) weights.  (w_x | w_misc | w_v | w_sg) is an exact row
    # partition of a single [INPUT_DIM, HIDDEN_DIM] W_in.
    w_x = jax.random.normal(ks[0], (EMBEDDING_DIM, HIDDEN_DIM), jnp.float32) * scale_in
    w_misc = jax.random.normal(ks[1], (MISC_DIM, HIDDEN_DIM), jnp.float32) * scale_in
    w_v = jax.random.normal(ks[2], (V_FLAT_DIM, HIDDEN_DIM), jnp.float32) * scale_in
    w_sg = jax.random.normal(ks[3], (SG_FEAT_DIM, HIDDEN_DIM), jnp.float32) * scale_in
    w_hid = jax.random.normal(ks[4], (NUM_LAYERS, HIDDEN_DIM, HIDDEN_DIM),
                              jnp.float32) * scale_h
    w_out = jax.random.normal(ks[5], (HIDDEN_DIM, OUTPUT_DIM), jnp.float32) * scale_h
    b_in = jax.random.uniform(ks[6], (HIDDEN_DIM,), jnp.float32, -scale_in, scale_in)
    b_hid = jax.random.uniform(ks[7], (NUM_LAYERS, HIDDEN_DIM), jnp.float32,
                               -scale_h, scale_h)
    b_out = jnp.zeros((OUTPUT_DIM,), jnp.float32)

    def pad_cols(w):
        return jnp.pad(w, ((0, 0), (0, H_PAD - HIDDEN_DIM)))

    # Precompute the SG projection table once (231x32), pad rows to 256 and
    # lanes to 128; padded rows/lanes are zero so out-of-range one-hot columns
    # and padded hidden lanes contribute exactly zero.
    sg_table = jnp.pad(sg_feature_tensor @ w_sg,
                       ((0, SG_ROWS_PAD - N_SG), (0, H_PAD - HIDDEN_DIM)))

    return {
        "sg_table": sg_table.astype(COMPUTE_DTYPE),
        "w_x": pad_cols(w_x).astype(COMPUTE_DTYPE),
        "w_misc": pad_cols(w_misc).astype(COMPUTE_DTYPE),
        "w_v": pad_cols(w_v).astype(COMPUTE_DTYPE),
        "b_in": jnp.pad(b_in, (0, H_PAD - HIDDEN_DIM)).reshape(1, H_PAD),
        "w_hid": jnp.pad(w_hid, ((0, 0),
                                 (0, H_PAD - HIDDEN_DIM),
                                 (0, H_PAD - HIDDEN_DIM))).astype(COMPUTE_DTYPE),
        "b_hid": jnp.pad(b_hid, ((0, 0), (0, H_PAD - HIDDEN_DIM))
                         ).reshape(NUM_LAYERS, 1, H_PAD),
        "w_out": jnp.pad(w_out, ((0, H_PAD - HIDDEN_DIM),
                                 (0, OUT_PAD - OUTPUT_DIM))).astype(COMPUTE_DTYPE),
        "b_out": jnp.pad(b_out, (0, OUT_PAD - OUTPUT_DIM)).reshape(1, OUT_PAD),
    }


# ---------------------------------------------------------------------------
# Demo
# ---------------------------------------------------------------------------
if __name__ == "__main__":
    key = jax.random.PRNGKey(0)
    (k_par, k_sg, k_x, k_v, k_p, k_l, k_a, k_pos, k_o, k_ind) = jax.random.split(key, 10)

    N = 2
    sg_feature_tensor = jax.random.normal(k_sg, (N_SG, SG_FEAT_DIM), jnp.float32)
    params = init_params(k_par, sg_feature_tensor)

    x = jax.random.normal(k_x, (N, EMBEDDING_DIM), jnp.float32)
    v = jax.random.normal(k_v, (N, EMBEDDING_DIM, 3), jnp.float32)
    sg_ind_list = jax.random.randint(k_ind, (N,), 1, 231, jnp.int32)
    prior = jax.random.normal(k_p, (N, 12), jnp.float32)
    max_length_step = jax.random.uniform(k_l, (N, 1), jnp.float32)
    max_angle_step = jax.random.uniform(k_a, (N, 1), jnp.float32)
    max_position_step = jax.random.uniform(k_pos, (N, 1), jnp.float32)
    max_orientation_step = jax.random.uniform(k_o, (N, 1), jnp.float32)

    fwd = jax.jit(crystal_generator_forward)
    out12, out_len_scale, out_rot_scale = fwd(
        params, x, v, sg_ind_list, prior, max_length_step,
        max_angle_step, max_position_step, max_orientation_step)

    jax.block_until_ready((out12, out_len_scale, out_rot_scale))

    assert out12.shape == (N, 12)
    assert out_len_scale.shape == (N,)
    assert out_rot_scale.shape == (N,)
    assert bool(jnp.all(jnp.isfinite(out12)))
    assert bool(jnp.all(jnp.isfinite(out_len_scale)))
    assert bool(jnp.all(jnp.isfinite(out_rot_scale)))

    # TODO(synk): scalarMLP internals (norm/dropout variants) are not in the
    # provided source; implemented as residual gelu MLP with norm=None,
    # dropout=0, tanh-approx gelu.
    print("KERNEL_OK")
</pallas_src>

<mosaic_0001>
module attributes {stable_mosaic.version = 11 : i64} {
  func.func @_mlp_kernel(%arg0: i32, %arg1: memref<16x32xf32, #tpu.memory_space<vmem>>, %arg2: memref<16x16xf32, #tpu.memory_space<vmem>>, %arg3: memref<16x96xf32, #tpu.memory_space<vmem>>, %arg4: memref<16x1xi32, #tpu.memory_space<vmem>>, %arg5: memref<256x128xbf16, #tpu.memory_space<vmem>>, %arg6: memref<32x128xbf16, #tpu.memory_space<vmem>>, %arg7: memref<16x128xbf16, #tpu.memory_space<vmem>>, %arg8: memref<96x128xbf16, #tpu.memory_space<vmem>>, %arg9: memref<1x128xf32, #tpu.memory_space<vmem>>, %arg10: memref<2x128x128xbf16, #tpu.memory_space<vmem>>, %arg11: memref<2x1x128xf32, #tpu.memory_space<vmem>>, %arg12: memref<128x128xbf16, #tpu.memory_space<vmem>>, %arg13: memref<1x128xf32, #tpu.memory_space<vmem>>, %arg14: memref<16x128xbf16, #tpu.memory_space<vmem>>) attributes {dimension_semantics = [#tpu.dimension_semantics<parallel>], iteration_bounds = array<i64: 1>, scalar_prefetch = 0 : i64, scratch_operands = 0 : i64, tpu.core_type = #tpu.core_type<tc>, window_params = [{transform_indices = @transform_0, window_bounds = array<i64: 16, 32>}, {transform_indices = @transform_1, window_bounds = array<i64: 16, 16>}, {transform_indices = @transform_2, window_bounds = array<i64: 16, 96>}, {transform_indices = @transform_3, window_bounds = array<i64: 16, 1>}, {pipeline_mode = #tpu.pipeline_mode<synchronous>, transform_indices = @transform_4, window_bounds = array<i64: 256, 128>}, {pipeline_mode = #tpu.pipeline_mode<synchronous>, transform_indices = @transform_5, window_bounds = array<i64: 32, 128>}, {pipeline_mode = #tpu.pipeline_mode<synchronous>, transform_indices = @transform_6, window_bounds = array<i64: 16, 128>}, {pipeline_mode = #tpu.pipeline_mode<synchronous>, transform_indices = @transform_7, window_bounds = array<i64: 96, 128>}, {pipeline_mode = #tpu.pipeline_mode<synchronous>, transform_indices = @transform_8, window_bounds = array<i64: 1, 128>}, {pipeline_mode = #tpu.pipeline_mode<synchronous>, transform_indices = @transform_9, window_bounds = array<i64: 2, 128, 128>}, {pipeline_mode = #tpu.pipeline_mode<synchronous>, transform_indices = @transform_10, window_bounds = array<i64: 2, 1, 128>}, {pipeline_mode = #tpu.pipeline_mode<synchronous>, transform_indices = @transform_11, window_bounds = array<i64: 128, 128>}, {pipeline_mode = #tpu.pipeline_mode<synchronous>, transform_indices = @transform_12, window_bounds = array<i64: 1, 128>}, {transform_indices = @transform_13, window_bounds = array<i64: 16, 128>}]} {
    %c0 = arith.constant 0 : index
    %c0_0 = arith.constant 0 : index
    %0 = vector.load %arg4[%c0, %c0_0] : memref<16x1xi32, #tpu.memory_space<vmem>>, vector<16x1xi32>
    %1 = tpu.iota {dimensions = array<i32: 1>} : vector<16x256xi32>
    %2 = vector.broadcast %0 : vector<16x1xi32> to vector<16x256xi32>
    %3 = arith.cmpi eq, %2, %1 : vector<16x256xi32>
    %4 = arith.extui %3 : vector<16x256xi1> to vector<16x256xi32>
    %5 = arith.sitofp %4 : vector<16x256xi32> to vector<16x256xf32>
    %6 = arith.truncf %5 : vector<16x256xf32> to vector<16x256xbf16>
    %c0_1 = arith.constant 0 : index
    %c0_2 = arith.constant 0 : index
    %7 = vector.load %arg1[%c0_1, %c0_2] : memref<16x32xf32, #tpu.memory_space<vmem>>, vector<16x32xf32>
    %8 = arith.truncf %7 : vector<16x32xf32> to vector<16x32xbf16>
    %c0_3 = arith.constant 0 : index
    %c0_4 = arith.constant 0 : index
    %9 = vector.load %arg6[%c0_3, %c0_4] : memref<32x128xbf16, #tpu.memory_space<vmem>>, vector<32x128xbf16>
    %cst = arith.constant dense<0.000000e+00> : vector<16x128xf32>
    %10 = tpu.matmul %8, %9, %cst {dimension_numbers = #tpu.dot_dimension_numbers<[1], [0], [0], [1], [0, 0, 1, 1], [], []>} : vector<16x32xbf16>, vector<32x128xbf16>, vector<16x128xf32> -> vector<16x128xf32>
    %c0_5 = arith.constant 0 : index
    %c0_6 = arith.constant 0 : index
    %11 = vector.load %arg2[%c0_5, %c0_6] : memref<16x16xf32, #tpu.memory_space<vmem>>, vector<16x16xf32>
    %12 = arith.truncf %11 : vector<16x16xf32> to vector<16x16xbf16>
    %c0_7 = arith.constant 0 : index
    %c0_8 = arith.constant 0 : index
    %13 = vector.load %arg7[%c0_7, %c0_8] : memref<16x128xbf16, #tpu.memory_space<vmem>>, vector<16x128xbf16>
    %cst_9 = arith.constant dense<0.000000e+00> : vector<16x128xf32>
    %14 = tpu.matmul %12, %13, %cst_9 {dimension_numbers = #tpu.dot_dimension_numbers<[1], [0], [0], [1], [0, 0, 1, 1], [], []>} : vector<16x16xbf16>, vector<16x128xbf16>, vector<16x128xf32> -> vector<16x128xf32>
    %15 = arith.addf %10, %14 : vector<16x128xf32>
    %c0_10 = arith.constant 0 : index
    %c0_11 = arith.constant 0 : index
    %16 = vector.load %arg3[%c0_10, %c0_11] : memref<16x96xf32, #tpu.memory_space<vmem>>, vector<16x96xf32>
    %17 = arith.truncf %16 : vector<16x96xf32> to vector<16x96xbf16>
    %c0_12 = arith.constant 0 : index
    %c0_13 = arith.constant 0 : index
    %18 = vector.load %arg8[%c0_12, %c0_13] : memref<96x128xbf16, #tpu.memory_space<vmem>>, vector<96x128xbf16>
    %cst_14 = arith.constant dense<0.000000e+00> : vector<16x128xf32>
    %19 = tpu.matmul %17, %18, %cst_14 {dimension_numbers = #tpu.dot_dimension_numbers<[1], [0], [0], [1], [0, 0, 1, 1], [], []>} : vector<16x96xbf16>, vector<96x128xbf16>, vector<16x128xf32> -> vector<16x128xf32>
    %20 = arith.addf %15, %19 : vector<16x128xf32>
    %c0_15 = arith.constant 0 : index
    %c0_16 = arith.constant 0 : index
    %21 = vector.load %arg5[%c0_15, %c0_16] : memref<256x128xbf16, #tpu.memory_space<vmem>>, vector<256x128xbf16>
    %cst_17 = arith.constant dense<0.000000e+00> : vector<16x128xf32>
    %22 = tpu.matmul %6, %21, %cst_17 {dimension_numbers = #tpu.dot_dimension_numbers<[1], [0], [0], [1], [0, 0, 1, 1], [], []>} : vector<16x256xbf16>, vector<256x128xbf16>, vector<16x128xf32> -> vector<16x128xf32>
    %23 = arith.addf %20, %22 : vector<16x128xf32>
    %c0_18 = arith.constant 0 : index
    %c0_19 = arith.constant 0 : index
    %24 = vector.load %arg9[%c0_18, %c0_19] : memref<1x128xf32, #tpu.memory_space<vmem>>, vector<1x128xf32>
    %25 = vector.broadcast %24 : vector<1x128xf32> to vector<16x128xf32>
    %26 = arith.addf %23, %25 : vector<16x128xf32>
    %27 = arith.truncf %26 : vector<16x128xf32> to vector<16x128xbf16>
    %c0_20 = arith.constant 0 : index
    %c0_21 = arith.constant 0 : index
    %c0_22 = arith.constant 0 : index
    %28 = vector.load %arg10[%c0_20, %c0_21, %c0_22] : memref<2x128x128xbf16, #tpu.memory_space<vmem>>, vector<1x128x128xbf16>
    %29 = vector.shape_cast %28 : vector<1x128x128xbf16> to vector<128x128xbf16>
    %cst_23 = arith.constant dense<0.000000e+00> : vector<16x128xf32>
    %30 = tpu.matmul %27, %29, %cst_23 {dimension_numbers = #tpu.dot_dimension_numbers<[1], [0], [0], [1], [0, 0, 1, 1], [], []>} : vector<16x128xbf16>, vector<128x128xbf16>, vector<16x128xf32> -> vector<16x128xf32>
    %c0_24 = arith.constant 0 : index
    %c0_25 = arith.constant 0 : index
    %c0_26 = arith.constant 0 : index
    %31 = vector.load %arg11[%c0_24, %c0_25, %c0_26] : memref<2x1x128xf32, #tpu.memory_space<vmem>>, vector<1x1x128xf32>
    %32 = vector.shape_cast %31 : vector<1x1x128xf32> to vector<1x128xf32>
    %33 = vector.broadcast %32 : vector<1x128xf32> to vector<16x128xf32>
    %34 = arith.addf %30, %33 : vector<16x128xf32>
    %35 = arith.mulf %34, %34 : vector<16x128xf32>
    %36 = arith.mulf %34, %35 : vector<16x128xf32>
    %cst_27 = arith.constant 4.471500e-02 : f32
    %37 = vector.broadcast %cst_27 : f32 to vector<16x128xf32>
    %38 = arith.mulf %37, %36 : vector<16x128xf32>
    %39 = arith.addf %34, %38 : vector<16x128xf32>
    %cst_28 = arith.constant 0.797884583 : f32
    %40 = vector.broadcast %cst_28 : f32 to vector<16x128xf32>
    %41 = arith.mulf %40, %39 : vector<16x128xf32>
    %42 = math.tanh %41 : vector<16x128xf32>
    %cst_29 = arith.constant 1.000000e+00 : f32
    %43 = vector.broadcast %cst_29 : f32 to vector<16x128xf32>
    %44 = arith.addf %43, %42 : vector<16x128xf32>
    %cst_30 = arith.constant 5.000000e-01 : f32
    %45 = vector.broadcast %cst_30 : f32 to vector<16x128xf32>
    %46 = arith.mulf %45, %44 : vector<16x128xf32>
    %47 = arith.mulf %34, %46 : vector<16x128xf32>
    %48 = arith.addf %26, %47 : vector<16x128xf32>
    %49 = arith.truncf %48 : vector<16x128xf32> to vector<16x128xbf16>
    %c1 = arith.constant 1 : index
    %c0_31 = arith.constant 0 : index
    %c0_32 = arith.constant 0 : index
    %50 = vector.load %arg10[%c1, %c0_31, %c0_32] : memref<2x128x128xbf16, #tpu.memory_space<vmem>>, vector<1x128x128xbf16>
    %51 = vector.shape_cast %50 : vector<1x128x128xbf16> to vector<128x128xbf16>
    %cst_33 = arith.constant dense<0.000000e+00> : vector<16x128xf32>
    %52 = tpu.matmul %49, %51, %cst_33 {dimension_numbers = #tpu.dot_dimension_numbers<[1], [0], [0], [1], [0, 0, 1, 1], [], []>} : vector<16x128xbf16>, vector<128x128xbf16>, vector<16x128xf32> -> vector<16x128xf32>
    %c1_34 = arith.constant 1 : index
    %c0_35 = arith.constant 0 : index
    %c0_36 = arith.constant 0 : index
    %53 = vector.load %arg11[%c1_34, %c0_35, %c0_36] : memref<2x1x128xf32, #tpu.memory_space<vmem>>, vector<1x1x128xf32>
    %54 = vector.shape_cast %53 : vector<1x1x128xf32> to vector<1x128xf32>
    %55 = vector.broadcast %54 : vector<1x128xf32> to vector<16x128xf32>
    %56 = arith.addf %52, %55 : vector<16x128xf32>
    %57 = arith.mulf %56, %56 : vector<16x128xf32>
    %58 = arith.mulf %56, %57 : vector<16x128xf32>
    %cst_37 = arith.constant 4.471500e-02 : f32
    %59 = vector.broadcast %cst_37 : f32 to vector<16x128xf32>
    %60 = arith.mulf %59, %58 : vector<16x128xf32>
    %61 = arith.addf %56, %60 : vector<16x128xf32>
    %cst_38 = arith.constant 0.797884583 : f32
    %62 = vector.broadcast %cst_38 : f32 to vector<16x128xf32>
    %63 = arith.mulf %62, %61 : vector<16x128xf32>
    %64 = math.tanh %63 : vector<16x128xf32>
    %cst_39 = arith.constant 1.000000e+00 : f32
    %65 = vector.broadcast %cst_39 : f32 to vector<16x128xf32>
    %66 = arith.addf %65, %64 : vector<16x128xf32>
    %cst_40 = arith.constant 5.000000e-01 : f32
    %67 = vector.broadcast %cst_40 : f32 to vector<16x128xf32>
    %68 = arith.mulf %67, %66 : vector<16x128xf32>
    %69 = arith.mulf %56, %68 : vector<16x128xf32>
    %70 = arith.addf %48, %69 : vector<16x128xf32>
    %71 = arith.truncf %70 : vector<16x128xf32> to vector<16x128xbf16>
    %c0_41 = arith.constant 0 : index
    %c0_42 = arith.constant 0 : index
    %72 = vector.load %arg12[%c0_41, %c0_42] : memref<128x128xbf16, #tpu.memory_space<vmem>>, vector<128x128xbf16>
    %cst_43 = arith.constant dense<0.000000e+00> : vector<16x128xf32>
    %73 = tpu.matmul %71, %72, %cst_43 {dimension_numbers = #tpu.dot_dimension_numbers<[1], [0], [0], [1], [0, 0, 1, 1], [], []>} : vector<16x128xbf16>, vector<128x128xbf16>, vector<16x128xf32> -> vector<16x128xf32>
    %c0_44 = arith.constant 0 : index
    %c0_45 = arith.constant 0 : index
    %74 = vector.load %arg13[%c0_44, %c0_45] : memref<1x128xf32, #tpu.memory_space<vmem>>, vector<1x128xf32>
    %75 = vector.broadcast %74 : vector<1x128xf32> to vector<16x128xf32>
    %76 = arith.addf %73, %75 : vector<16x128xf32>
    %77 = arith.truncf %76 : vector<16x128xf32> to vector<16x128xbf16>
    %c0_46 = arith.constant 0 : index
    %c0_47 = arith.constant 0 : index
    %78 = vector.load %arg14[%c0_46, %c0_47] : memref<16x128xbf16, #tpu.memory_space<vmem>>, vector<16x128xbf16>
    tpu.vector_store %arg14[%c0_46, %c0_47], %77 {strides = array<i32>} : memref<16x128xbf16, #tpu.memory_space<vmem>>, vector<16x128xbf16>,
    return
  }
  func.func @transform_0(%arg0: i32) -> (i32, i32) {
    %c0_i32 = arith.constant 0 : i32
    %c0_i32_0 = arith.constant 0 : i32
    return %arg0, %c0_i32 : i32, i32
  }
  func.func @transform_1(%arg0: i32) -> (i32, i32) {
    %c0_i32 = arith.constant 0 : i32
    %c0_i32_0 = arith.constant 0 : i32
    return %arg0, %c0_i32 : i32, i32
  }
  func.func @transform_2(%arg0: i32) -> (i32, i32) {
    %c0_i32 = arith.constant 0 : i32
    %c0_i32_0 = arith.constant 0 : i32
    return %arg0, %c0_i32 : i32, i32
  }
  func.func @transform_3(%arg0: i32) -> (i32, i32) {
    %c0_i32 = arith.constant 0 : i32
    %c0_i32_0 = arith.constant 0 : i32
    return %arg0, %c0_i32 : i32, i32
  }
  func.func @transform_4(%arg0: i32) -> (i32, i32) {
    %c0_i32 = arith.constant 0 : i32
    %c0_i32_0 = arith.constant 0 : i32
    %c0_i32_1 = arith.constant 0 : i32
    return %c0_i32, %c0_i32_0 : i32, i32
  }
  func.func @transform_5(%arg0: i32) -> (i32, i32) {
    %c0_i32 = arith.constant 0 : i32
    %c0_i32_0 = arith.constant 0 : i32
    %c0_i32_1 = arith.constant 0 : i32
    return %c0_i32, %c0_i32_0 : i32, i32
  }
  func.func @transform_6(%arg0: i32) -> (i32, i32) {
    %c0_i32 = arith.constant 0 : i32
    %c0_i32_0 = arith.constant 0 : i32
    %c0_i32_1 = arith.constant 0 : i32
    return %c0_i32, %c0_i32_0 : i32, i32
  }
  func.func @transform_7(%arg0: i32) -> (i32, i32) {
    %c0_i32 = arith.constant 0 : i32
    %c0_i32_0 = arith.constant 0 : i32
    %c0_i32_1 = arith.constant 0 : i32
    return %c0_i32, %c0_i32_0 : i32, i32
  }
  func.func @transform_8(%arg0: i32) -> (i32, i32) {
    %c0_i32 = arith.constant 0 : i32
    %c0_i32_0 = arith.constant 0 : i32
    %c0_i32_1 = arith.constant 0 : i32
    return %c0_i32, %c0_i32_0 : i32, i32
  }
  func.func @transform_9(%arg0: i32) -> (i32, i32, i32) {
    %c0_i32 = arith.constant 0 : i32
    %c0_i32_0 = arith.constant 0 : i32
    %c0_i32_1 = arith.constant 0 : i32
    %c0_i32_2 = arith.constant 0 : i32
    return %c0_i32, %c0_i32_0, %c0_i32_1 : i32, i32, i32
  }
  func.func @transform_10(%arg0: i32) -> (i32, i32, i32) {
    %c0_i32 = arith.constant 0 : i32
    %c0_i32_0 = arith.constant 0 : i32
    %c0_i32_1 = arith.constant 0 : i32
    %c0_i32_2 = arith.constant 0 : i32
    return %c0_i32, %c0_i32_0, %c0_i32_1 : i32, i32, i32
  }
  func.func @transform_11(%arg0: i32) -> (i32, i32) {
    %c0_i32 = arith.constant 0 : i32
    %c0_i32_0 = arith.constant 0 : i32
    %c0_i32_1 = arith.constant 0 : i32
    return %c0_i32, %c0_i32_0 : i32, i32
  }
  func.func @transform_12(%arg0: i32) -> (i32, i32) {
    %c0_i32 = arith.constant 0 : i32
    %c0_i32_0 = arith.constant 0 : i32
    %c0_i32_1 = arith.constant 0 : i32
    return %c0_i32, %c0_i32_0 : i32, i32
  }
  func.func @transform_13(%arg0: i32) -> (i32, i32) {
    %c0_i32 = arith.constant 0 : i32
    %c0_i32_0 = arith.constant 0 : i32
    return %arg0, %c0_i32 : i32, i32
  }
}

</mosaic_0001>

<bundles_post_ra>
// kernel: crystal_generator_forward.1
= control target key start
LH: loop header
LB: loop body
LE: loop exit
PB: predicated region body
PF: predicated region fallthrough
CT: control target
= control target key end

     0   :  { %18 = vsyncpa [#allocation3], 0  ;;  %s1835_s0 = inlined_call_operand.hbm [shape: f32[2,32], index: 0, kind: input, shape index: {}]   ;;  %s1836_s1 = inlined_call_operand.vmem [shape: f32[2,16], index: 1, kind: input, shape index: {}]   ;;  %s1837_s2 = inlined_call_operand.vmem [shape: f32[2,96], index: 2, kind: input, shape index: {}]   ;;  %s1838_s3 = inlined_call_operand.vmem [shape: s32[2,1], index: 3, kind: input, shape index: {}]   ;;  %s1839_s4 = inlined_call_operand.vmem [shape: bf16[256,128], index: 4, kind: input, shape index: {}]   ;;  %s1840_s5 = inlined_call_operand.hbm [shape: bf16[32,128], index: 5, kind: input, shape index: {}]   ;;  %s1841_s6 = inlined_call_operand.hbm [shape: bf16[16,128], index: 6, kind: input, shape index: {}]   ;;  %s1842_s7 = inlined_call_operand.hbm [shape: bf16[96,128], index: 7, kind: input, shape index: {}]   ;;  %s1843_s8 = inlined_call_operand.hbm [shape: f32[1,128], index: 8, kind: input, shape index: {}]   ;;  %s1844_s9 = inlined_call_operand.hbm [shape: bf16[2,128,128], index: 9, kind: input, shape index: {}]   ;;  %s1845_s10 = inlined_call_operand.vmem [shape: f32[2,1,128], index: 10, kind: input, shape index: {}]   ;;  %s1846_s11 = inlined_call_operand.vmem [shape: bf16[128,128], index: 11, kind: input, shape index: {}]   ;;  %s1847_s12 = inlined_call_operand.hbm [shape: f32[1,128], index: 12, kind: input, shape index: {}]   ;;  %s1848_s13 = inlined_call_operand.vmem [shape: bf16[2,128], index: 13, kind: output, shape index: {}]  }
   0x1   :  { %19 = vsyncpa [#allocation5], 0 }
   0x2   :  { %20 = vsyncpa [#allocation8], 0 }
   0x3   :  { %21 = vsyncpa [#allocation11], 0 }
   0x4   :  { %26 = vsyncadd [#allocation3], 224  ;;  %s1507_s25 = smov [#allocation4]   ;;  %s1345_s29 = scalar_lea.hbm %s1840_s5, 256 }
   0x5   :  { %s47_s26 = sshll.u32 %s1507_s25, 4  ;;  %p1346_p0 = scmp.ne.s32.totalorder %s1840_s5, %s1345_s29  ;;  %s48_s26 = int_to_ptr.vmem [resolvable:$true] %s47_s26 }
   0x6   :  { %p1349_p1 = scmp.lt.u32.totalorder %s1345_s29, %s1840_s5 }
   0x8   :  { %p1351_p2 = pnand %p1349_p1, %p1346_p0 }
   0xa   :  { %1354 = shalt.err (!%p1351_p2)
}
   0xb   :  { %s1355_s17 = scalar_lea.vmem %s48_s26, 256  ;;  %p1360_p4 = scmp.lt.s32.totalorder %s48_s26, %s48_s26 }
   0xc   :  { %p1356_p3 = scmp.ne.s32.totalorder %s48_s26, %s1355_s17  ;;  %p1361_p5 = scmp.lt.s32.totalorder %s1355_s17, %s1355_s17 }
   0xe   :  { %p1362_p6 = por %p1361_p5, %p1360_p4 }
  0x10   :  { %p1363_p7 = pnand %p1362_p6, %p1356_p3 }
  0x12   :  { %1366 = shalt.err (!%p1363_p7)
}
  0x13   :  { %s1508_s18 = smov 64   ;;  %s1509_s19 = smov 4  }
  0x14   :  { %53 = dma.hbm_to_vmem [thread:$0]  %s1840_s5, 256, %s48_s26, [#allocation5], %s1508_s18, %s1508_s18, %s1509_s19  }
  0x15   :  { %s1510_s22 = smov [#allocation7]   ;;  %s1511_s24 = smov [#allocation10]  }
  0x16   :  { %s71_s23 = sshll.u32 %s1510_s22, 4  ;;  %s93_s25 = sshll.u32 %s1511_s24, 4  ;;  %s72_s23 = int_to_ptr.vmem [resolvable:$true] %s71_s23  ;;  %s94_s25 = int_to_ptr.vmem [resolvable:$true] %s93_s25 }
  0x17   :  { %s1367_s29 = scalar_lea.hbm %s1842_s7, 768 }
  0x18   :  { %p1368_p8 = scmp.ne.s32.totalorder %s1842_s7, %s1367_s29  ;;  %p1371_p9 = scmp.lt.u32.totalorder %s1367_s29, %s1842_s7 }
  0x1a   :  { %p1373_p10 = pnand %p1371_p9, %p1368_p8 }
  0x1c   :  { %1376 = shalt.err (!%p1373_p10)
}
  0x1d   :  { %s1377_s5 = scalar_lea.vmem %s72_s23, 768  ;;  %p1382_p12 = scmp.lt.s32.totalorder %s72_s23, %s72_s23 }
  0x1e   :  { %p1378_p11 = scmp.ne.s32.totalorder %s72_s23, %s1377_s5  ;;  %p1383_p13 = scmp.lt.s32.totalorder %s1377_s5, %s1377_s5 }
  0x20   :  { %p1384_p0 = por %p1383_p13, %p1382_p12 }
  0x22   :  { %p1385_p1 = pnand %p1384_p0, %p1378_p11 }
  0x24   :  { %1388 = shalt.err (!%p1385_p1)
}
  0x25   :  { %77 = dma.hbm_to_vmem [thread:$0]  %s1842_s7, 768, %s72_s23, [#allocation8], %s1508_s18, %s1508_s18, %s1509_s19  }
  0x26   :  { %s1389_s22 = scalar_lea.hbm %s1844_s9, 2048 }
  0x27   :  { %p1390_p2 = scmp.ne.s32.totalorder %s1844_s9, %s1389_s22  ;;  %p1393_p3 = scmp.lt.u32.totalorder %s1389_s22, %s1844_s9 }
  0x29   :  { %p1395_p4 = pnand %p1393_p3, %p1390_p2 }
  0x2b   :  { %1398 = shalt.err (!%p1395_p4)
}
  0x2c   :  { %s1399_s30 = scalar_lea.vmem %s94_s25, 2048  ;;  %p1404_p6 = scmp.lt.s32.totalorder %s94_s25, %s94_s25 }
  0x2d   :  { %p1400_p5 = scmp.ne.s32.totalorder %s94_s25, %s1399_s30  ;;  %p1405_p7 = scmp.lt.s32.totalorder %s1399_s30, %s1399_s30 }
  0x2f   :  { %p1406_p8 = por %p1405_p7, %p1404_p6 }
  0x31   :  { %p1407_p9 = pnand %p1406_p8, %p1400_p5 }
  0x33   :  { %1410 = shalt.err (!%p1407_p9)
}
  0x34   :  { %99 = dma.hbm_to_vmem [thread:$0]  %s1844_s9, 2048, %s94_s25, [#allocation11], %s1508_s18, %s1508_s18, %s1509_s19  }
  0x35   :  { %s1512_s14 = smov [#allocation2]   ;;  %s1411_s26 = scalar_lea.hbm %s1835_s0, 32 }
  0x36   :  { %s27_s15 = sshll.u32 %s1512_s14, 4  ;;  %p1412_p10 = scmp.ne.s32.totalorder %s1835_s0, %s1411_s26  ;;  %s28_s15 = int_to_ptr.vmem [resolvable:$true] %s27_s15 }
  0x37   :  { %p1415_p11 = scmp.lt.u32.totalorder %s1411_s26, %s1835_s0 }
  0x39   :  { %p1417_p12 = pnand %p1415_p11, %p1412_p10 }
  0x3b   :  { %1420 = shalt.err (!%p1417_p12)
}
  0x3c   :  { %s1421_s24 = scalar_lea.vmem %s28_s15, 32  ;;  %s1425_s9 = scalar_lea.vmem %s28_s15, 256 }
  0x3d   :  { %p1422_p13 = scmp.ne.s32.totalorder %s28_s15, %s1421_s24  ;;  %p1426_p0 = scmp.lt.s32.totalorder %s28_s15, %s28_s15 }
  0x3e   :  { %p1427_p1 = scmp.lt.s32.totalorder %s1425_s9, %s1421_s24 }
  0x40   :  { %p1428_p2 = por %p1427_p1, %p1426_p0 }
  0x42   :  { %p1429_p3 = pnand %p1428_p2, %p1422_p13 }
  0x44   :  { %1432 = shalt.err (!%p1429_p3)
}
  0x45   :  { %s1513_s25 = smov 32   ;;  %s1514_s27 = smov 2  }
  0x46   :  { %33 = dma.hbm_to_vmem [thread:$0]  %s1835_s0, 32, %s28_s15, [#allocation3], %s1513_s25, %s1513_s25, %s1514_s27  }
  0x47   :  { %s1515_s30 = smov [#allocation6]   ;;  %s1516_s23 = smov [#allocation9]  }
  0x48   :  { %s59_s7 = sshll.u32 %s1515_s30, 4  ;;  %s84_s14 = sshll.u32 %s1516_s23, 4  ;;  %s60_s7 = int_to_ptr.vmem [resolvable:$true] %s59_s7  ;;  %s85_s14 = int_to_ptr.vmem [resolvable:$true] %s84_s14 }
  0x49   :  { %s1433_s26 = scalar_lea.hbm %s1841_s6, 128 }
  0x4a   :  { %p1434_p4 = scmp.ne.s32.totalorder %s1841_s6, %s1433_s26  ;;  %p1437_p5 = scmp.lt.u32.totalorder %s1433_s26, %s1841_s6 }
  0x4c   :  { %p1439_p6 = pnand %p1437_p5, %p1434_p4 }
  0x4e   :  { %1442 = shalt.err (!%p1439_p6)
}
  0x4f   :  { %s1443_s0 = scalar_lea.vmem %s60_s7, 128  ;;  %p1448_p8 = scmp.lt.s32.totalorder %s60_s7, %s60_s7 }
  0x50   :  { %p1444_p7 = scmp.ne.s32.totalorder %s60_s7, %s1443_s0  ;;  %p1449_p9 = scmp.lt.s32.totalorder %s1443_s0, %s1443_s0 }
  0x52   :  { %p1450_p10 = por %p1449_p9, %p1448_p8 }
  0x54   :  { %p1451_p11 = pnand %p1450_p10, %p1444_p7 }
  0x56   :  { %1454 = shalt.err (!%p1451_p11)
}
  0x57   :  { %65 = dma.hbm_to_vmem [thread:$0]  %s1841_s6, 128, %s60_s7, [#allocation5], %s1508_s18, %s1508_s18, %s1509_s19  }
  0x58   :  { %s1455_s27 = scalar_lea.hbm %s1843_s8, 16 }
  0x59   :  { %p1456_p12 = scmp.ne.s32.totalorder %s1843_s8, %s1455_s27  ;;  %p1459_p13 = scmp.lt.u32.totalorder %s1455_s27, %s1843_s8 }
  0x5b   :  { %p1461_p0 = pnand %p1459_p13, %p1456_p12 }
  0x5d   :  { %1464 = shalt.err (!%p1461_p0)
}
  0x5e   :  { %s1465_s16 = scalar_lea.vmem %s85_s14, 16  ;;  %s1469_s5 = scalar_lea.vmem %s85_s14, 32 }
  0x5f   :  { %p1466_p1 = scmp.ne.s32.totalorder %s85_s14, %s1465_s16  ;;  %p1470_p2 = scmp.lt.s32.totalorder %s85_s14, %s85_s14 }
  0x60   :  { %p1471_p3 = scmp.lt.s32.totalorder %s1469_s5, %s1465_s16 }
  0x62   :  { %p1472_p4 = por %p1471_p3, %p1470_p2 }
  0x64   :  { %p1473_p5 = pnand %p1472_p4, %p1466_p1 }
  0x66   :  { %1476 = shalt.err (!%p1473_p5)
}
  0x67   :  { %87 = dma.hbm_to_vmem [thread:$0]  %s1843_s8, 16, %s85_s14, [#allocation8]  }
  0x68   :  { %s1517_s19 = smov [#allocation12]   ;;  %s1477_s20 = scalar_lea.hbm %s1847_s12, 16 }
  0x69   :  { %s110_s7 = sshll.u32 %s1517_s19, 4  ;;  %p1478_p6 = scmp.ne.s32.totalorder %s1847_s12, %s1477_s20  ;;  %s111_s7 = int_to_ptr.vmem [resolvable:$true] %s110_s7 }
  0x6a   :  { %p1481_p7 = scmp.lt.u32.totalorder %s1477_s20, %s1847_s12 }
  0x6c   :  { %p1483_p8 = pnand %p1481_p7, %p1478_p6 }
  0x6e   :  { %1486 = shalt.err (!%p1483_p8)
}
  0x6f   :  { %s1487_s24 = scalar_lea.vmem %s111_s7, 16  ;;  %s1491_s8 = scalar_lea.vmem %s111_s7, 32 }
  0x70   :  { %p1488_p9 = scmp.ne.s32.totalorder %s111_s7, %s1487_s24  ;;  %p1492_p10 = scmp.lt.s32.totalorder %s111_s7, %s111_s7 }
  0x71   :  { %p1493_p11 = scmp.lt.s32.totalorder %s1491_s8, %s1487_s24 }
  0x73   :  { %p1494_p12 = por %p1493_p11, %p1492_p10 }
  0x75   :  { %p1495_p13 = pnand %p1494_p12, %p1488_p9 }
  0x77   :  { %1498 = shalt.err (!%p1495_p13)
}
  0x78   :  { %113 = dma.hbm_to_vmem [thread:$0]  %s1847_s12, 16, %s111_s7, [#allocation11]  }
  0x79   :  { %1499 = dma.done.wait [#allocation3], 256  }
  0x7a   :  { %1500 = vsyncadd [#allocation3], 4294967040 }
  0x7b   :  { %1501 = dma.done.wait [#allocation5], 384  }
  0x7c   :  { %1502 = vsyncadd [#allocation5], 4294966912 }
  0x7d   :  { %1503 = dma.done.wait [#allocation8], 784  }
  0x7e   :  { %1504 = vsyncadd [#allocation8], 4294966512 }
  0x7f   :  { %1505 = dma.done.wait [#allocation11], 2064  }
  0x80   :  { %1506 = vsyncadd [#allocation11], 4294965232  ;;  %v1518_v0 = vmov 0   ;;  %v1519_v1 = vmov 0.0   ;;  %vm1520_vm0 = vmmov 0   ;;  %v136_v2 = vld [vmem:[%s1838_s3] sm:$0xff]  ;;  %v138_v41 = vlaneseq }
  0x81   :  { %1287 = vset.pattern.permute.xlu0 %v1518_v0  ;;  %1195 = vmatprep.subr.bf16.mxu0 %v1519_v1  ;;  %v1288_v3 = vld [vmem:[#allocation7] sm:$0xff]   ;;  %v1289_v5 = vld [vmem:[#allocation7 + $0x8] sm:$0xff]   ;;  %v1291_v6 = vld [vmem:[#allocation6] sm:$0xff]   ;;  %vm179_vm1 = vcmask 130048   ;;  %vm236_vm2 = vcmask 261120   ;;  %vm332_vm3 = vcmask 785408  }
  0x82   :  { %1181 = vmatprep.subr.bf16.mxu1 %v1519_v1  ;;  %1183 = vmatprep.mubr.msk.bf16.mxu1 %vm1520_vm0, %v1519_v1  ;;  %v137_v4 = vld [vmem:[%s1838_s3 + $0x8] sm:$0xff]  ;;  %v1290_v7 = vld [vmem:[#allocation7 + $0x10] sm:$0xff]   ;;  %v168_v8 = vld [vmem:[%s1836_s1] sm:$0xff]  ;;  %v139_v43 = vand.u32 127, %v138_v41  ;;  %v1521_v48 = vmov 1.0|1.0  }
  0x83   :  { %1207 = vmatprep.mubr.msk.bf16.mxu0 %vm1520_vm0, %v1519_v1  ;;  %142 = vperm.xlu0 %1287, %v136_v2   ;;  %v169_v9 = vld [vmem:[%s1836_s1 + $0x8] sm:$0xff]  ;;  %v1293_v11 = vld [vmem:[#allocation4] sm:$0xff]   ;;  %v1295_v12 = vld [vmem:[#allocation4 + $0x8] sm:$0xff]  }
  0x84   :  { %1196 = vmatpush3.bf16.msra.mxu0 %v1288_v3  ;;  %1182 = vmatpush3.bf16.msra.mxu1 %v1291_v6  ;;  %v170_v10 = vpack.c.bf16 %v169_v9, %v168_v8  ;;  %v161_v13 = vld [vmem:[#allocation2] sm:$0xff]  ;;  %v162_v14 = vld [vmem:[#allocation2 + $0x8] sm:$0xff]  ;;  %v1296_v21 = vld [vmem:[#allocation7 + $0x28] sm:$0xff]   ;;  %v140_v46 = vadd.s32 128, %v139_v43 }
  0x85   :  { %1197 = vmatprep.subr.bf16.mxu0 %v1519_v1  ;;  %1187 = vmatprep.subr.bf16.mxu1 %v1519_v1  ;;  %v1292_v15 = vld [vmem:[#allocation7 + $0x18] sm:$0xff]   ;;  %v1294_v17 = vld [vmem:[#allocation7 + $0x20] sm:$0xff]   ;;  %v163_v18 = vpack.c.bf16 %v162_v14, %v161_v13  ;;  %v1301_v25 = vld [vmem:[%s1839_s4 + $0x50] sm:$0xff]  }
  0x86   :  { %v1297_v16 = vld [vmem:[%s1839_s4 + $0x40] sm:$0xff]   ;;  %v1299_v20 = vld [vmem:[%s1839_s4 + $0x48] sm:$0xff]   ;;  %v1302_v27 = vld [vmem:[%s1839_s4 + $0x10] sm:$0xff]  }
  0x87   :  { %145 = vperm.xlu0 %1287, %v137_v4   ;;  %1184 = vmatmul.mubr.msk.bf16.vlgmr.msra.gmra.mrb[0].mxu1 %vm179_vm1, %v170_v10  ;;  %v1298_v19 = vld [vmem:[%s1839_s4] sm:$0xff]   ;;  %v282_v23 = vld [vmem:[%s1837_s2 + $0x8] sm:$0xff]  ;;  %v1303_v28 = vld [vmem:[%s1839_s4 + $0x58] sm:$0xff]  }
  0x88   :  { %1198 = vmatpush3.bf16.msra.mxu0 %v1289_v5  ;;  %1188 = vmatpush3.bf16.msra.mxu1 %v1293_v11  ;;  %v281_v22 = vld [vmem:[%s1837_s2] sm:$0xff]  ;;  %v1300_v24 = vld [vmem:[%s1839_s4 + $0x8] sm:$0xff]   ;;  %v1304_v29 = vld [vmem:[%s1839_s4 + $0x18] sm:$0xff]  }
  0x89   :  { %1199 = vmatprep.subr.bf16.mxu0 %v1519_v1  ;;  %1191 = vmatprep.mubr.msk.bf16.mxu1 %vm1520_vm0, %v1519_v1  ;;  %v283_v26 = vpack.c.bf16 %v282_v23, %v281_v22  ;;  %v1305_v30 = vld [vmem:[%s1839_s4 + $0x60] sm:$0xff]   ;;  %v1307_v32 = vld [vmem:[%s1839_s4 + $0x68] sm:$0xff]   ;;  %v1309_v34 = vld [vmem:[%s1839_s4 + $0x70] sm:$0xff]  }
  0x8a   :  { %1189 = vmatprep.subr.bf16.mxu1 %v1519_v1  ;;  %v1306_v31 = vld [vmem:[%s1839_s4 + $0x20] sm:$0xff]   ;;  %v1308_v33 = vld [vmem:[%s1839_s4 + $0x28] sm:$0xff]   ;;  %v1310_v35 = vld [vmem:[%s1839_s4 + $0x30] sm:$0xff]  }
  0x8b   :  { %v1311_v36 = vld [vmem:[%s1839_s4 + $0x78] sm:$0xff]   ;;  %v1314_v39 = vld [vmem:[#allocation10 + $0x8] sm:$0xff]   ;;  %v1315_v40 = vld [vmem:[#allocation10 + $0x10] sm:$0xff]  }
  0x8c   :  { %1200 = vmatpush3.bf16.msra.mxu0 %v1290_v7  ;;  %1190 = vmatpush3.bf16.msra.mxu1 %v1295_v12  ;;  %v1312_v37 = vld [vmem:[%s1839_s4 + $0x38] sm:$0xff]   ;;  %v1318_v49 = vld [vmem:[#allocation10 + $0x28] sm:$0xff]   ;;  %v1319_v54 = vld [vmem:[#allocation10 + $0x30] sm:$0xff]  }
  0x8d   :  { %1201 = vmatprep.subr.bf16.mxu0 %v1519_v1  ;;  %1132 = vmatprep.subr.bf16.mxu1 %v1297_v16  ;;  %v1313_v38 = vld [vmem:[#allocation10] sm:$0xff]   ;;  %v1316_v42 = vld [vmem:[#allocation10 + $0x18] sm:$0xff]   ;;  %v1326_v22 = vld [vmem:[#allocation10 + $0x68] sm:$0xff]  }
  0x8e   :  { %v1317_v44 = vld [vmem:[#allocation10 + $0x20] sm:$0xff]   ;;  %v1320_v55 = vld [vmem:[#allocation10 + $0x38] sm:$0xff]   ;;  %v1327_v23 = vld [vmem:[#allocation10 + $0x70] sm:$0xff]  }
  0x8f   :  { %1192 = vmatmul.mubr.msk.bf16.vlgmr.msra.gmra.mrb[4].mxu1 %vm236_vm2, %v163_v18  ;;  %v1086_v12 = vld [vmem:[#allocation9] ss:$0 sm:$0xff]  ;;  %v1322_v18 = vld [vmem:[#allocation10 + $0x48] sm:$0xff]  }
  0x90   :  { %1202 = vmatpush3.bf16.msra.mxu0 %v1292_v15  ;;  %1133 = vmatpush3.bf16.msra.mxu1 %v1298_v19  ;;  %v1323_v19 = vld [vmem:[#allocation10 + $0x50] sm:$0xff]  }
  0x91   :  { %1203 = vmatprep.subr.bf16.mxu0 %v1519_v1  ;;  %1134 = vmatprep.subr.bf16.mxu1 %v1299_v20  ;;  %v1324_v20 = vld [vmem:[#allocation10 + $0x58] sm:$0xff]  }
  0x94   :  { %1204 = vmatpush3.bf16.msra.mxu0 %v1294_v17  ;;  %1135 = vmatpush3.bf16.msra.mxu1 %v1300_v24  ;;  %v1321_v17 = vld [vmem:[#allocation10 + $0x40] sm:$0xff]   ;;  %v1328_v24 = vld [vmem:[#allocation10 + $0x78] sm:$0xff]  }
  0x95   :  { %1205 = vmatprep.subr.bf16.mxu0 %v1519_v1  ;;  %1136 = vmatprep.subr.bf16.mxu1 %v1301_v25  ;;  %v1087_v25 = vld [vmem:[%s1845_s10] ss:$0 sm:$0xff] }
  0x98   :  { %1206 = vmatpush3.bf16.msra.mxu0 %v1296_v21  ;;  %1137 = vmatpush3.bf16.msra.mxu1 %v1302_v27  ;;  %v1325_v21 = vld [vmem:[#allocation10 + $0x60] sm:$0xff]  }
  0x99   :  { %1211 = vmatprep.subr.bf16.mxu0 %v1519_v1  ;;  %1138 = vmatprep.subr.bf16.mxu1 %v1303_v28 }
  0x9b   :  { %1208 = vmatmul.mubr.msk.bf16.vlgmr.msra.gmra.mrb[0].mxu0 %vm332_vm3, %v283_v26 }
  0x9c   :  { %1227 = vmatprep.mubr.msk.bf16.mxu0 %vm1520_vm0, %v1519_v1  ;;  %1139 = vmatpush3.bf16.msra.mxu1 %v1304_v29 }
  0x9d   :  { %1140 = vmatprep.subr.bf16.mxu1 %v1305_v30  ;;  %1212 = vmatpush3.bf16.msra.mxu0 %v1313_v38 }
  0x9e   :  { %1213 = vmatprep.subr.bf16.mxu0 %v1519_v1 }
  0xa0   :  { %1141 = vmatpush3.bf16.msra.mxu1 %v1306_v31 }
  0xa1   :  { %1142 = vmatprep.subr.bf16.mxu1 %v1307_v32  ;;  %1214 = vmatpush3.bf16.msra.mxu0 %v1314_v39 }
  0xa2   :  { %1215 = vmatprep.subr.bf16.mxu0 %v1519_v1 }
  0xa4   :  { %1143 = vmatpush3.bf16.msra.mxu1 %v1308_v33 }
  0xa5   :  { %1144 = vmatprep.subr.bf16.mxu1 %v1309_v34  ;;  %1216 = vmatpush3.bf16.msra.mxu0 %v1315_v40 }
  0xa6   :  { %1217 = vmatprep.subr.bf16.mxu0 %v1519_v1 }
  0xa8   :  { %1145 = vmatpush3.bf16.msra.mxu1 %v1310_v35 }
  0xa9   :  { %1146 = vmatprep.subr.bf16.mxu1 %v1311_v36  ;;  %1218 = vmatpush3.bf16.msra.mxu0 %v1316_v42 }
  0xaa   :  { %1219 = vmatprep.subr.bf16.mxu0 %v1519_v1 }
  0xac   :  { %1147 = vmatpush3.bf16.msra.mxu1 %v1312_v37 }
  0xad   :  { %1231 = vmatprep.subr.bf16.mxu1 %v1519_v1  ;;  %1220 = vmatpush3.bf16.msra.mxu0 %v1317_v44 }
  0xae   :  { %1221 = vmatprep.subr.bf16.mxu0 %v1519_v1 }
  0xb1   :  { %1222 = vmatpush3.bf16.msra.mxu0 %v1318_v49 }
  0xb2   :  { %1223 = vmatprep.subr.bf16.mxu0 %v1519_v1 }
  0xb5   :  { %1224 = vmatpush3.bf16.msra.mxu0 %v1319_v54  ;;  %v1329_v54 = vld [vmem:[%s1846_s11] sm:$0xff]  }
  0xb6   :  { %1225 = vmatprep.subr.bf16.mxu0 %v1519_v1 }
  0xb9   :  { %1226 = vmatpush3.bf16.msra.mxu0 %v1320_v55  ;;  %v1330_v55 = vld [vmem:[%s1846_s11 + $0x8] sm:$0xff]  }
  0xba   :  { %1251 = vmatprep.subr.bf16.mxu0 %v1519_v1 }
 0x102   :  { %v143_v45 = vpop.permute.xlu0 %142 }
 0x103   :  { %vm148_vm4 = vcmp.eq.s32.totalorder %v143_v45, %v140_v46  ;;  %vm147_vm7 = vcmp.eq.s32.totalorder %v143_v45, %v139_v43 }
 0x106   :  { %v146_v47 = vpop.permute.xlu0 %145 }
 0x107   :  { %vm149_vm5 = vcmp.eq.s32.totalorder %v146_v47, %v139_v43  ;;  %vm150_vm6 = vcmp.eq.s32.totalorder %v146_v47, %v140_v46 }
 0x108   :  { %vm1082_vm8 = vmpackc.low %vm150_vm6, %vm148_vm4 }
 0x109   :  { %vm1084_vm9 = vmpackc.low %vm149_vm5, %vm147_vm7  ;;  %1083 = vmatprep.mubr.msk.bf16.mxu1 %vm1082_vm8, %v1521_v48 }
 0x10a   :  { %1085 = vmatmul.mubr.msk.bf16.vlgmr.msra.gmra.mrb[8].mxu1 %vm1084_vm9, %v1521_v48 }
 0x10b   :  { %1247 = vmatprep.mubr.msk.bf16.mxu1 %vm1520_vm0, %v1519_v1  ;;  %1232 = vmatpush3.bf16.msra.mxu1 %v1321_v17 }
 0x10c   :  { %1233 = vmatprep.subr.bf16.mxu1 %v1519_v1 }
 0x10f   :  { %1234 = vmatpush3.bf16.msra.mxu1 %v1322_v18 }
 0x110   :  { %1235 = vmatprep.subr.bf16.mxu1 %v1519_v1 }
 0x113   :  { %1236 = vmatpush3.bf16.msra.mxu1 %v1323_v19 }
 0x114   :  { %1237 = vmatprep.subr.bf16.mxu1 %v1519_v1 }
 0x117   :  { %1238 = vmatpush3.bf16.msra.mxu1 %v1324_v20 }
 0x118   :  { %1239 = vmatprep.subr.bf16.mxu1 %v1519_v1 }
 0x11b   :  { %1240 = vmatpush3.bf16.msra.mxu1 %v1325_v21 }
 0x11c   :  { %1241 = vmatprep.subr.bf16.mxu1 %v1519_v1 }
 0x11f   :  { %1242 = vmatpush3.bf16.msra.mxu1 %v1326_v22 }
 0x120   :  { %1243 = vmatprep.subr.bf16.mxu1 %v1519_v1 }
 0x123   :  { %1244 = vmatpush3.bf16.msra.mxu1 %v1327_v23 }
 0x124   :  { %1245 = vmatprep.subr.bf16.mxu1 %v1519_v1 }
 0x127   :  { %1246 = vmatpush3.bf16.msra.mxu1 %v1328_v24 }
 0x15a   :  { %v217_v50 = vpop.f32.mrb[0].mxu1 }
 0x15b   :  { %v1185_v51 = vpop.f32.mrb[1].mxu1 }
 0x15c   :  { %v220_v52 = vpop.f32.mrb[2].mxu1 }
 0x15d   :  { %v1186_v53 = vpop.f32.mrb[3].mxu1 }
 0x162   :  { %v274_v56 = vpop.f32.mrb[4].mxu1 }
 0x163   :  { %v275_v57 = vadd.f32 %v274_v56, %v217_v50  ;;  %v1193_v58 = vpop.f32.mrb[5].mxu1  ;;  %v1331_v56 = vld [vmem:[%s1846_s11 + $0x10] sm:$0xff]  }
 0x164   :  { %v277_v59 = vpop.f32.mrb[6].mxu1  ;;  %v1333_v58 = vld [vmem:[%s1846_s11 + $0x20] sm:$0xff]  }
 0x165   :  { %v278_v60 = vadd.f32 %v277_v59, %v220_v52  ;;  %v1194_v61 = vpop.f32.mrb[7].mxu1  ;;  %v1334_v59 = vld [vmem:[%s1846_s11 + $0x28] sm:$0xff]  }
 0x166   :  { %v1336_v61 = vld [vmem:[%s1846_s11 + $0x38] sm:$0xff]  }
 0x16e   :  { %v370_v62 = vpop.f32.mrb[0].mxu0 }
 0x16f   :  { %v377_v63 = vadd.f32 %v370_v62, %v275_v57  ;;  %v1209_v0 = vpop.f32.mrb[1].mxu0  ;;  %v1332_v57 = vld [vmem:[%s1846_s11 + $0x18] sm:$0xff]   ;;  %v1097_v62 = vld [vmem:[%s1845_s10 + $0x1] ss:$0 sm:$0xff] }
 0x170   :  { %v373_v2 = vpop.f32.mrb[2].mxu0 }
 0x171   :  { %v378_v3 = vadd.f32 %v373_v2, %v278_v60  ;;  %v1210_v4 = vpop.f32.mrb[3].mxu0  ;;  %v1335_v60 = vld [vmem:[%s1846_s11 + $0x30] sm:$0xff]  }
 0x1dd   :  { %v1148_v5 = vpop.f32.mrb[8].mxu1 }
 0x1de   :  { %v1149_v6 = vpop.f32.mrb[9].mxu1 }
 0x1df   :  { %v1150_v7 = vadd.f32 %v1149_v6, %v1148_v5  ;;  %v1151_v8 = vpop.f32.mrb[10].mxu1 }
 0x1e0   :  { %v1152_v9 = vpop.f32.mrb[11].mxu1 }
 0x1e1   :  { %v548_v10 = vadd.f32 %v1150_v7, %v377_v63  ;;  %v1153_v11 = vadd.f32 %v1152_v9, %v1151_v8 }
 0x1e3   :  { %v549_v13 = vadd.f32 %v1153_v11, %v378_v3  ;;  %v557_v14 = vadd.f32 %v1086_v12, %v548_v10 }
 0x1e5   :  { %v558_v15 = vadd.f32 %v1086_v12, %v549_v13 }
 0x1e7   :  { %v559_v16 = vpack.c.bf16 %v558_v15, %v557_v14 }
 0x1e9   :  { %1228 = vmatmul.mubr.bf16.vlgmr.msra.gmra.mrb[4].mxu0 %v559_v16 }
 0x1ea   :  { %1267 = vmatprep.mubr.msk.bf16.mxu0 %vm1520_vm0, %v1519_v1  ;;  %1252 = vmatpush3.bf16.msra.mxu0 %v1329_v54 }
 0x1eb   :  { %1253 = vmatprep.subr.bf16.mxu0 %v1519_v1 }
 0x1ee   :  { %1254 = vmatpush3.bf16.msra.mxu0 %v1330_v55 }
 0x1ef   :  { %1255 = vmatprep.subr.bf16.mxu0 %v1519_v1 }
 0x1f2   :  { %1256 = vmatpush3.bf16.msra.mxu0 %v1331_v56 }
 0x1f3   :  { %1257 = vmatprep.subr.bf16.mxu0 %v1519_v1 }
 0x1f6   :  { %1258 = vmatpush3.bf16.msra.mxu0 %v1332_v57 }
 0x1f7   :  { %1259 = vmatprep.subr.bf16.mxu0 %v1519_v1 }
 0x1fa   :  { %1260 = vmatpush3.bf16.msra.mxu0 %v1333_v58 }
 0x1fb   :  { %1261 = vmatprep.subr.bf16.mxu0 %v1519_v1 }
 0x1fe   :  { %1262 = vmatpush3.bf16.msra.mxu0 %v1334_v59 }
 0x1ff   :  { %1263 = vmatprep.subr.bf16.mxu0 %v1519_v1 }
 0x202   :  { %1264 = vmatpush3.bf16.msra.mxu0 %v1335_v60 }
 0x203   :  { %1265 = vmatprep.subr.bf16.mxu0 %v1519_v1 }
 0x206   :  { %1266 = vmatpush3.bf16.msra.mxu0 %v1336_v61 }
 0x2bc   :  { %v665_v26 = vpop.f32.mrb[4].mxu0 }
 0x2bd   :  { %v666_v27 = vadd.f32 %v1087_v25, %v665_v26  ;;  %v1229_v28 = vpop.f32.mrb[5].mxu0  ;;  %v1522_v26 = vmov 1966171168  }
 0x2be   :  { %v668_v29 = vpop.f32.mrb[6].mxu0 }
 0x2bf   :  { %v672_v30 = vmul.f32 %v666_v27, %v666_v27  ;;  %v669_v31 = vadd.f32 %v1087_v25, %v668_v29  ;;  %v1230_v32 = vpop.f32.mrb[7].mxu0  ;;  %v947_v29 = vshrl.u32 %v138_v41, 7 }
 0x2c1   :  { %v674_v33 = vmul.f32 %v672_v30, %v666_v27  ;;  %v673_v34 = vmul.f32 %v669_v31, %v669_v31  ;;  %v1106_v30 = vld [vmem:[#allocation12] ss:$0 sm:$0xff] }
 0x2c3   :  { %v676_v35 = vmul.f32 0.044715, %v674_v33  ;;  %v675_v36 = vmul.f32 %v673_v34, %v669_v31 }
 0x2c5   :  { %v678_v37 = vadd.f32 %v676_v35, %v666_v27  ;;  %v677_v38 = vmul.f32 0.044715, %v675_v36 }
 0x2c7   :  { %v680_v39 = vmul.f32 0.7978846, %v678_v37  ;;  %v679_v40 = vadd.f32 %v677_v38, %v669_v31 }
 0x2c9   :  { %1337 = vtanh.f32 %v680_v39  ;;  %v681_v42 = vmul.f32 0.7978846, %v679_v40 }
 0x2cb   :  { %1339 = vtanh.f32 %v681_v42 }
 0x2d3   :  { %v1338_v43 = vpop.eup %1337 }
 0x2d4   :  { %v684_v44 = vadd.f32 1.0, %v1338_v43 }
 0x2d5   :  { %v1340_v45 = vpop.eup %1339 }
 0x2d6   :  { %v686_v46 = vmul.f32 0.5, %v684_v44  ;;  %v685_v47 = vadd.f32 1.0, %v1340_v45 }
 0x2d8   :  { %v688_v48 = vmul.f32 %v686_v46, %v666_v27  ;;  %v687_v49 = vmul.f32 0.5, %v685_v47  ;;  %v944_v27 = vunpack.c.l.s4 %v1522_v26 }
 0x2da   :  { %v689_v50 = vmul.f32 %v687_v49, %v669_v31  ;;  %v690_v51 = vadd.f32 %v688_v48, %v557_v14  ;;  %v945_v28 = vunpack.c.0.s8 %v944_v27 }
 0x2dc   :  { %v691_v52 = vadd.f32 %v689_v50, %v558_v15  ;;  %v948_v34 = vsub.s32 %v945_v28, %v947_v29 }
 0x2de   :  { %v692_v53 = vpack.c.bf16 %v691_v52, %v690_v51 }
 0x2e0   :  { %1248 = vmatmul.mubr.bf16.vlgmr.msra.gmra.mrb[12].mxu1 %v692_v53 }
 0x3b3   :  { %v800_v63 = vpop.f32.mrb[12].mxu1 }
 0x3b4   :  { %v801_v0 = vadd.f32 %v1097_v62, %v800_v63  ;;  %v1249_v2 = vpop.f32.mrb[13].mxu1 }
 0x3b5   :  { %v803_v3 = vpop.f32.mrb[14].mxu1 }
 0x3b6   :  { %v807_v4 = vmul.f32 %v801_v0, %v801_v0  ;;  %v804_v5 = vadd.f32 %v1097_v62, %v803_v3  ;;  %v1250_v6 = vpop.f32.mrb[15].mxu1 }
 0x3b8   :  { %v809_v7 = vmul.f32 %v807_v4, %v801_v0  ;;  %v808_v8 = vmul.f32 %v804_v5, %v804_v5 }
 0x3ba   :  { %v811_v9 = vmul.f32 0.044715, %v809_v7  ;;  %v810_v10 = vmul.f32 %v808_v8, %v804_v5 }
 0x3bc   :  { %v813_v11 = vadd.f32 %v811_v9, %v801_v0  ;;  %v812_v12 = vmul.f32 0.044715, %v810_v10 }
 0x3be   :  { %v815_v13 = vmul.f32 0.7978846, %v813_v11  ;;  %v814_v1 = vadd.f32 %v812_v12, %v804_v5 }
 0x3c0   :  { %1341 = vtanh.f32 %v815_v13  ;;  %v816_v14 = vmul.f32 0.7978846, %v814_v1 }
 0x3c2   :  { %1343 = vtanh.f32 %v816_v14 }
 0x3ca   :  { %v1342_v15 = vpop.eup %1341 }
 0x3cb   :  { %v819_v16 = vadd.f32 1.0, %v1342_v15 }
 0x3cc   :  { %v1344_v17 = vpop.eup %1343 }
 0x3cd   :  { %v821_v18 = vmul.f32 0.5, %v819_v16  ;;  %v820_v19 = vadd.f32 1.0, %v1344_v17 }
 0x3cf   :  { %v823_v20 = vmul.f32 %v821_v18, %v801_v0  ;;  %v822_v21 = vmul.f32 0.5, %v820_v19 }
 0x3d1   :  { %v824_v22 = vmul.f32 %v822_v21, %v804_v5  ;;  %v825_v23 = vadd.f32 %v823_v20, %v690_v51 }
 0x3d3   :  { %v826_v24 = vadd.f32 %v824_v22, %v691_v52 }
 0x3d5   :  { %v827_v25 = vpack.c.bf16 %v826_v24, %v825_v23 }
 0x3d7   :  { %1268 = vmatmul.mubr.bf16.vlgmr.msra.gmra.mrb[8].mxu0 %v827_v25 }
 0x4aa   :  { %v933_v31 = vpop.f32.mrb[8].mxu0 }
 0x4ab   :  { %v1269_v32 = vpop.f32.mrb[9].mxu0  ;;  %v934_v35 = vadd.f32 %v1106_v30, %v933_v31 }
 0x4ac   :  { %v936_v33 = vpop.f32.mrb[10].mxu0 }
 0x4ad   :  { %v937_v36 = vadd.f32 %v1106_v30, %v936_v33  ;;  %v1270_v37 = vpop.f32.mrb[11].mxu0 }
 0x4af   :  { %v940_v38 = vpack.c.bf16 %v937_v36, %v934_v35 }
 0x4b1   :  { %v949_v39 = vrot.slane %v940_v38, %v948_v34 }
 0x4b3   :  { %1116 = vst.sshfl [vmem:[#allocation13] sm:$0x1 pattern:$0x73625140] %v949_v39 }
 0x4ba   :  { %v1024_v40 = vld [vmem:[#allocation13] sm:$0x1] }
 0x4bb   :  { %1025 = vst [vmem:[%s1848_s13] sm:$0x1] %v1024_v40 }
 0x4bc   :  { %1042 = vsyncpa [#allocation3], 1 }
 0x4bd   :  { %1043 = vsyncpa [#allocation5], 1 }
 0x4be   :  { %1044 = vsyncpa [#allocation8], 1 }
 0x4bf   :  { %1045 = vsyncpa [#allocation11], 1 }

</bundles_post_ra>
